<compile_context>
chip_gen: v5e
topology: v5e:2x2
jax: 0.10.0
libtpu: 0.0.40
codegen_flags: <defaults>
</compile_context>

<pallas_src>
import functools
import math

import jax
import jax.numpy as jnp
from jax.experimental import pallas as pl
from jax.experimental.pallas import tpu as pltpu


def _round_up(x, m):
    return ((x + m - 1) // m) * m


# --- fused sincos constants (Cephes single precision) -----------------------
_TWO_OVER_PI = 0.6366197723675814
# pi/2 split (Cody-Waite), each piece exactly representable with spare bits.
_PI2_A = 1.5703125
_PI2_B = 4.837512969970703125e-4
_PI2_C = 7.54978995489188e-8
# sin(r) ~ ((S0*z + S1)*z + S2)*z*r + r,  z = r*r,  |r| <= pi/4
_S0 = -1.9515295891e-4
_S1 = 8.3321608736e-3
_S2 = -1.6666654611e-1
# cos(r) ~ ((C0*z + C1)*z + C2)*z*z - 0.5*z + 1
_C0 = 2.443315711809948e-5
_C1 = -1.388731625493765e-3
_C2 = 4.166664568298827e-2


def _geo_embed_kernel(pos_ref, wrt_ref, o_ref, *, inv_div):
    """One grid step: (bm, P) position rows -> (bm, 2*E) Fourier features.

    pos_ref : VMEM (bm, P)    -- flattened positions tile
    wrt_ref : VMEM (P, E)     -- Wr transposed (same block every step)
    o_ref   : VMEM (bm, 2*E)  -- output features tile
    """
    pos = pos_ref[...].astype(jnp.float32)          # (bm, P)
    wrt = wrt_ref[...].astype(jnp.float32)          # (P, E)
    P, E = wrt.shape

    # Unrolled VPU outer-product accumulation over the tiny pos_dim axis.
    proj = pos[:, 0:1] * wrt[0:1, :]                # (bm, E)
    for p in range(1, P):
        proj = proj + pos[:, p:p + 1] * wrt[p:p + 1, :]

    # ---- fused sincos: shared range reduction + shared powers --------------
    q = jnp.floor(proj * _TWO_OVER_PI + 0.5)        # nearest quadrant index
    r = ((proj - q * _PI2_A) - q * _PI2_B) - q * _PI2_C   # |r| <= pi/4
    z = r * r
    sin_r = ((_S0 * z + _S1) * z + _S2) * z * r + r
    cos_r = ((_C0 * z + _C1) * z + _C2) * (z * z) - 0.5 * z + 1.0

    n = q.astype(jnp.int32)
    swap = (n & 1) == 1                             # odd quadrant: swap sin/cos
    sin_sel = jnp.where(swap, cos_r, sin_r)
    cos_sel = jnp.where(swap, sin_r, cos_r)
    # Fold 1/sqrt(f_dim) into the quadrant sign -> one multiply per half.
    sin_scale = jnp.where((n & 2) == 2, -inv_div, inv_div)
    cos_scale = jnp.where(((n + 1) & 2) == 2, -inv_div, inv_div)

    # Direct half-writes (no concatenate, no extra (bm, 2E) temporary).
    o_ref[:, 0:E] = (sin_sel * sin_scale).astype(o_ref.dtype)
    o_ref[:, E:2 * E] = (cos_sel * cos_scale).astype(o_ref.dtype)


def continuous_geographical_embedding(pos, Wr, *, block_m=1024,
                                      vmem_budget_bytes=32 << 20):
    """pos: (..., pos_dim), Wr: (enc_dim, pos_dim) -> (..., 2*enc_dim)."""
    *lead, P = pos.shape
    E, P_w = Wr.shape
    assert P == P_w, "pos last dim must match Wr's pos_dim"
    f_dim = 2 * E
    inv_div = 1.0 / math.sqrt(float(f_dim))

    # Force a float output dtype (sin/cos of int positions must not cast back).
    out_dtype = pos.dtype if jnp.issubdtype(pos.dtype, jnp.floating) else jnp.float32

    pos2d = pos.reshape(-1, P)
    M = pos2d.shape[0]

    # Per-block VMEM working set (f32): double-buffered pos tile (lane-padded
    # to 128), double-buffered output tile, ~4 elementwise temporaries.
    def block_bytes(bm):
        lanes_out = max(f_dim, 128)
        return (2 * bm * 128 * 4
                + 2 * bm * lanes_out * 4
                + 4 * bm * lanes_out * 4)

    # Row tile: large (amortize grid-step overhead), sublane-aligned, shrunk
    # until the working set fits the budget (safe for v7x's 64 MiB VMEM).
    bm = min(block_m, _round_up(M, 8))
    bm = max(8, (bm // 8) * 8)
    while bm > 8 and block_bytes(bm) > vmem_budget_bytes:
        bm = max(8, (bm // 2 // 8) * 8)

    Mp = _round_up(M, bm)
    if Mp != M:
        # TODO(synk): handle the ragged last tile with an in-kernel masked
        # store instead of a whole-array pad + slice copy.
        pos2d = jnp.pad(pos2d, ((0, Mp - M), (0, 0)))

    wrt = jnp.transpose(Wr)  # (P, E): kernel consumes Wr pre-transposed

    # Raise the scoped VMEM limit (v5e defaults to 16 MiB) with headroom, but
    # stay under v7x's 64 MiB physical VMEM.
    vmem_limit = int(min(56 << 20, max(2 * block_bytes(bm), 16 << 20)))

    out = pl.pallas_call(
        functools.partial(_geo_embed_kernel, inv_div=inv_div),
        out_shape=jax.ShapeDtypeStruct((Mp, f_dim), out_dtype),
        grid=(Mp // bm,),
        in_specs=[
            pl.BlockSpec((bm, P), lambda i: (i, 0)),
            pl.BlockSpec((P, E), lambda i: (0, 0)),
        ],
        out_specs=pl.BlockSpec((bm, f_dim), lambda i: (i, 0)),
        compiler_params=pltpu.CompilerParams(
            dimension_semantics=("parallel",),
            vmem_limit_bytes=vmem_limit),
    )(pos2d, wrt)

    if Mp != M:
        out = out[:M]
    return out.reshape(*lead, f_dim)


def _reference(pos, Wr, f_dim):
    """Pure-JAX reference mirroring the PyTorch forward."""
    proj = jnp.matmul(pos, Wr.T, precision=jax.lax.Precision.HIGHEST)
    return jnp.concatenate([jnp.sin(proj), jnp.cos(proj)], axis=-1) / math.sqrt(
        float(f_dim))


if __name__ == "__main__":
    B, S, pos_dim, f_dim = 2, 8, 2, 32
    enc_dim = f_dim // 2
    sigma = 1.0

    key = jax.random.PRNGKey(0)
    k_pos, k_w = jax.random.split(key)
    # Position-like continuous inputs (e.g. normalized lat/lon).
    pos = jax.random.normal(k_pos, (B, S, pos_dim), dtype=jnp.float32)
    # Fixed random projection matrix (module attribute, not a trained param).
    Wr = jax.random.normal(k_w, (enc_dim, pos_dim), dtype=jnp.float32) * sigma ** 2

    out = continuous_geographical_embedding(pos, Wr)
    out = jax.block_until_ready(out)

    ref = _reference(pos, Wr, f_dim)
    assert out.shape == (B, S, f_dim)
    assert jnp.allclose(out, ref, atol=1e-4, rtol=1e-4)

    print("KERNEL_OK")
</pallas_src>

<mosaic_0001>
module attributes {stable_mosaic.version = 11 : i64} {
  func.func @_geo_embed_kernel(%arg0: i32, %arg1: memref<16x2xf32, #tpu.memory_space<vmem>>, %arg2: memref<2x16xf32, #tpu.memory_space<vmem>>, %arg3: memref<16x32xf32, #tpu.memory_space<vmem>>) attributes {dimension_semantics = [#tpu.dimension_semantics<parallel>], iteration_bounds = array<i64: 1>, scalar_prefetch = 0 : i64, scratch_operands = 0 : i64, tpu.core_type = #tpu.core_type<tc>, window_params = [{transform_indices = @transform_0, window_bounds = array<i64: 16, 2>}, {pipeline_mode = #tpu.pipeline_mode<synchronous>, transform_indices = @transform_1, window_bounds = array<i64: 2, 16>}, {transform_indices = @transform_2, window_bounds = array<i64: 16, 32>}]} {
    %c0 = arith.constant 0 : index
    %c0_0 = arith.constant 0 : index
    %0 = vector.load %arg1[%c0, %c0_0] : memref<16x2xf32, #tpu.memory_space<vmem>>, vector<16x2xf32>
    %c0_1 = arith.constant 0 : index
    %c0_2 = arith.constant 0 : index
    %1 = vector.load %arg2[%c0_1, %c0_2] : memref<2x16xf32, #tpu.memory_space<vmem>>, vector<2x16xf32>
    %2 = vector.extract_strided_slice %0 {offsets = [0, 0], sizes = [16, 1], strides = [1, 1]} : vector<16x2xf32> to vector<16x1xf32>
    %3 = vector.extract_strided_slice %1 {offsets = [0, 0], sizes = [1, 16], strides = [1, 1]} : vector<2x16xf32> to vector<1x16xf32>
    %4 = vector.broadcast %2 : vector<16x1xf32> to vector<16x16xf32>
    %5 = vector.broadcast %3 : vector<1x16xf32> to vector<16x16xf32>
    %6 = arith.mulf %4, %5 : vector<16x16xf32>
    %7 = vector.extract_strided_slice %0 {offsets = [0, 1], sizes = [16, 1], strides = [1, 1]} : vector<16x2xf32> to vector<16x1xf32>
    %8 = vector.extract_strided_slice %1 {offsets = [1, 0], sizes = [1, 16], strides = [1, 1]} : vector<2x16xf32> to vector<1x16xf32>
    %9 = vector.broadcast %7 : vector<16x1xf32> to vector<16x16xf32>
    %10 = vector.broadcast %8 : vector<1x16xf32> to vector<16x16xf32>
    %11 = arith.mulf %9, %10 : vector<16x16xf32>
    %12 = arith.addf %6, %11 : vector<16x16xf32>
    %cst = arith.constant 0.636619746 : f32
    %13 = vector.broadcast %cst : f32 to vector<16x16xf32>
    %14 = arith.mulf %12, %13 : vector<16x16xf32>
    %cst_3 = arith.constant 5.000000e-01 : f32
    %15 = vector.broadcast %cst_3 : f32 to vector<16x16xf32>
    %16 = arith.addf %14, %15 : vector<16x16xf32>
    %17 = math.floor %16 : vector<16x16xf32>
    %cst_4 = arith.constant 1.5703125 : f32
    %18 = vector.broadcast %cst_4 : f32 to vector<16x16xf32>
    %19 = arith.mulf %17, %18 : vector<16x16xf32>
    %20 = arith.subf %12, %19 : vector<16x16xf32>
    %cst_5 = arith.constant 4.83751297E-4 : f32
    %21 = vector.broadcast %cst_5 : f32 to vector<16x16xf32>
    %22 = arith.mulf %17, %21 : vector<16x16xf32>
    %23 = arith.subf %20, %22 : vector<16x16xf32>
    %cst_6 = arith.constant 7.549790e-08 : f32
    %24 = vector.broadcast %cst_6 : f32 to vector<16x16xf32>
    %25 = arith.mulf %17, %24 : vector<16x16xf32>
    %26 = arith.subf %23, %25 : vector<16x16xf32>
    %27 = arith.mulf %26, %26 : vector<16x16xf32>
    %cst_7 = arith.constant -1.95152956E-4 : f32
    %28 = vector.broadcast %cst_7 : f32 to vector<16x16xf32>
    %29 = arith.mulf %28, %27 : vector<16x16xf32>
    %cst_8 = arith.constant 0.00833216123 : f32
    %30 = vector.broadcast %cst_8 : f32 to vector<16x16xf32>
    %31 = arith.addf %29, %30 : vector<16x16xf32>
    %32 = arith.mulf %31, %27 : vector<16x16xf32>
    %cst_9 = arith.constant -0.166666552 : f32
    %33 = vector.broadcast %cst_9 : f32 to vector<16x16xf32>
    %34 = arith.addf %32, %33 : vector<16x16xf32>
    %35 = arith.mulf %34, %27 : vector<16x16xf32>
    %36 = arith.mulf %35, %26 : vector<16x16xf32>
    %37 = arith.addf %36, %26 : vector<16x16xf32>
    %cst_10 = arith.constant 2.44331568E-5 : f32
    %38 = vector.broadcast %cst_10 : f32 to vector<16x16xf32>
    %39 = arith.mulf %38, %27 : vector<16x16xf32>
    %cst_11 = arith.constant -0.00138873165 : f32
    %40 = vector.broadcast %cst_11 : f32 to vector<16x16xf32>
    %41 = arith.addf %39, %40 : vector<16x16xf32>
    %42 = arith.mulf %41, %27 : vector<16x16xf32>
    %cst_12 = arith.constant 0.0416666456 : f32
    %43 = vector.broadcast %cst_12 : f32 to vector<16x16xf32>
    %44 = arith.addf %42, %43 : vector<16x16xf32>
    %45 = arith.mulf %27, %27 : vector<16x16xf32>
    %46 = arith.mulf %44, %45 : vector<16x16xf32>
    %cst_13 = arith.constant 5.000000e-01 : f32
    %47 = vector.broadcast %cst_13 : f32 to vector<16x16xf32>
    %48 = arith.mulf %47, %27 : vector<16x16xf32>
    %49 = arith.subf %46, %48 : vector<16x16xf32>
    %cst_14 = arith.constant 1.000000e+00 : f32
    %50 = vector.broadcast %cst_14 : f32 to vector<16x16xf32>
    %51 = arith.addf %49, %50 : vector<16x16xf32>
    %52 = arith.fptosi %17 : vector<16x16xf32> to vector<16x16xi32>
    %c1_i32 = arith.constant 1 : i32
    %53 = vector.broadcast %c1_i32 : i32 to vector<16x16xi32>
    %54 = arith.andi %52, %53 : vector<16x16xi32>
    %c1_i32_15 = arith.constant 1 : i32
    %55 = vector.broadcast %c1_i32_15 : i32 to vector<16x16xi32>
    %56 = arith.cmpi eq, %54, %55 : vector<16x16xi32>
    %57 = arith.select %56, %51, %37 : vector<16x16xi1>, vector<16x16xf32>
    %58 = arith.select %56, %37, %51 : vector<16x16xi1>, vector<16x16xf32>
    %c2_i32 = arith.constant 2 : i32
    %59 = vector.broadcast %c2_i32 : i32 to vector<16x16xi32>
    %60 = arith.andi %52, %59 : vector<16x16xi32>
    %c2_i32_16 = arith.constant 2 : i32
    %61 = vector.broadcast %c2_i32_16 : i32 to vector<16x16xi32>
    %62 = arith.cmpi eq, %60, %61 : vector<16x16xi32>
    %cst_17 = arith.constant -0.176776692 : f32
    %cst_18 = arith.constant 0.176776692 : f32
    %63 = vector.broadcast %cst_17 : f32 to vector<16x16xf32>
    %64 = vector.broadcast %cst_18 : f32 to vector<16x16xf32>
    %65 = arith.select %62, %63, %64 : vector<16x16xi1>, vector<16x16xf32>
    %c1_i32_19 = arith.constant 1 : i32
    %66 = vector.broadcast %c1_i32_19 : i32 to vector<16x16xi32>
    %67 = arith.addi %52, %66 : vector<16x16xi32>
    %c2_i32_20 = arith.constant 2 : i32
    %68 = vector.broadcast %c2_i32_20 : i32 to vector<16x16xi32>
    %69 = arith.andi %67, %68 : vector<16x16xi32>
    %c2_i32_21 = arith.constant 2 : i32
    %70 = vector.broadcast %c2_i32_21 : i32 to vector<16x16xi32>
    %71 = arith.cmpi eq, %69, %70 : vector<16x16xi32>
    %cst_22 = arith.constant -0.176776692 : f32
    %cst_23 = arith.constant 0.176776692 : f32
    %72 = vector.broadcast %cst_22 : f32 to vector<16x16xf32>
    %73 = vector.broadcast %cst_23 : f32 to vector<16x16xf32>
    %74 = arith.select %71, %72, %73 : vector<16x16xi1>, vector<16x16xf32>
    %75 = arith.mulf %57, %65 : vector<16x16xf32>
    %c0_24 = arith.constant 0 : index
    %c0_25 = arith.constant 0 : index
    %76 = vector.load %arg3[%c0_24, %c0_25] : memref<16x32xf32, #tpu.memory_space<vmem>>, vector<16x16xf32>
    tpu.vector_store %arg3[%c0_24, %c0_25], %75 {strides = array<i32>} : memref<16x32xf32, #tpu.memory_space<vmem>>, vector<16x16xf32>,
    %77 = arith.mulf %58, %74 : vector<16x16xf32>
    %c0_26 = arith.constant 0 : index
    %c16 = arith.constant 16 : index
    %78 = vector.load %arg3[%c0_26, %c16] : memref<16x32xf32, #tpu.memory_space<vmem>>, vector<16x16xf32>
    tpu.vector_store %arg3[%c0_26, %c16], %77 {strides = array<i32>} : memref<16x32xf32, #tpu.memory_space<vmem>>, vector<16x16xf32>,
    return
  }
  func.func @transform_0(%arg0: i32) -> (i32, i32) {
    %c0_i32 = arith.constant 0 : i32
    %c0_i32_0 = arith.constant 0 : i32
    return %arg0, %c0_i32 : i32, i32
  }
  func.func @transform_1(%arg0: i32) -> (i32, i32) {
    %c0_i32 = arith.constant 0 : i32
    %c0_i32_0 = arith.constant 0 : i32
    %c0_i32_1 = arith.constant 0 : i32
    return %c0_i32, %c0_i32_0 : i32, i32
  }
  func.func @transform_2(%arg0: i32) -> (i32, i32) {
    %c0_i32 = arith.constant 0 : i32
    %c0_i32_0 = arith.constant 0 : i32
    return %arg0, %c0_i32 : i32, i32
  }
}

</mosaic_0001>

<bundles_post_ra>
// kernel: tpu_custom_call.1
= control target key start
LH: loop header
LB: loop body
LE: loop exit
PB: predicated region body
PF: predicated region fallthrough
CT: control target
= control target key end

     0   :  { %v193_v1 = vmov 1   ;;  %v194_v2 = vmov 0   ;;  %s229_s0 = inlined_call_operand.vmem [shape: f32[16,2], index: 0, kind: input, shape index: {}]   ;;  %s230_s1 = inlined_call_operand.vmem [shape: f32[2,16], index: 1, kind: input, shape index: {}]   ;;  %s231_s2 = inlined_call_operand.hbm [shape: f32[16,32], index: 2, kind: output, shape index: {}]  }
   0x1   :  { %v12_v0 = vld [vmem:[%s229_s0] sm:$0xff]  ;;  %165 = vset.pattern.permute.xlu1 %v193_v1  ;;  %164 = vset.pattern.permute.xlu0 %v194_v2 }
   0x2   :  { %7 = vsyncpa [#allocation3], 0  ;;  %29 = vperm.xlu1 %165, %v12_v0   ;;  %17 = vperm.xlu0 %164, %v12_v0   ;;  %v13_v3 = vld [vmem:[%s229_s0 + $0x8] sm:$0xff]  ;;  %v14_v4 = vld [vmem:[%s230_s1] sm:$0x3]  ;;  %vm119_vm2 = vcmask 130048  }
   0x3   :  { %v36_v5 = vperm.slane %v14_v4, 1  ;;  %v25_v6 = vperm.slane %v14_v4, 0  ;;  %v195_v2 = vmov 0.17677669   ;;  %s196_s0 = smov 16   ;;  %vm132_vm7 = vcmask 261248  }
   0x4   :  { %s197_s1 = smov [#allocation2]   ;;  %s141_s18 = sshll.u32 %s231_s2, 4  ;;  %s142_s18 = int_to_ptr.hbm [resolvable:$true] %s141_s18 }
   0x5   :  { %s139_s15 = sshll.u32 %s197_s1, 4  ;;  %s198_s19 = smov 128   ;;  %s140_s15 = int_to_ptr.vmem [resolvable:$true] %s139_s15 }
   0x6   :  { %s199_s20 = smov 8  }
   0xa   :  { %33 = vperm.xlu1 %165, %v13_v3   ;;  %22 = vperm.xlu0 %164, %v13_v3  }
  0x12   :  { %166 = vset.pattern.permute.xlu0 %v193_v1 }
  0x74   :  { %v30_v7 = vpop.permute.xlu1 %29  ;;  %v18_v8 = vpop.permute.xlu0 %17 }
  0x75   :  { %v37_v9 = vmul.f32 %v36_v5, %v30_v7  ;;  %v26_v10 = vmul.f32 %v25_v6, %v18_v8 }
  0x77   :  { %v39_v11 = vadd.f32 %v37_v9, %v26_v10 }
  0x79   :  { %v41_v12 = vmul.f32 0.63661975, %v39_v11 }
  0x7b   :  { %v43_v13 = vadd.f32 0.5, %v41_v12 }
  0x7c   :  { %v34_v14 = vpop.permute.xlu1 %33  ;;  %v23_v15 = vpop.permute.xlu0 %22 }
  0x7d   :  { %v45_v16 = vfloor.f32 %v43_v13  ;;  %v38_v17 = vmul.f32 %v36_v5, %v34_v14  ;;  %v27_v18 = vmul.f32 %v25_v6, %v23_v15 }
  0x7f   :  { %v47_v19 = vmul.f32 1.5703125, %v45_v16  ;;  %v40_v20 = vadd.f32 %v38_v17, %v27_v18  ;;  %v51_v22 = vmul.f32 0.0004837513, %v45_v16  ;;  %v55_v25 = vmul.f32 7.54979e-08, %v45_v16 }
  0x80   :  { %v154_v29 = vcvt.f32.s32 %v45_v16 }
  0x81   :  { %v49_v21 = vsub.f32 %v39_v11, %v47_v19  ;;  %v42_v23 = vmul.f32 0.63661975, %v40_v20 }
  0x82   :  { %v109_v36 = vadd.s32 1, %v154_v29  ;;  %v103_v45 = vand.u32 2, %v154_v29  ;;  %v95_v56 = vand.u32 1, %v154_v29 }
  0x83   :  { %v53_v24 = vsub.f32 %v49_v21, %v51_v22  ;;  %v44_v26 = vadd.f32 0.5, %v42_v23 }
  0x84   :  { %v111_v44 = vand.u32 2, %v109_v36  ;;  %vm105_vm1 = vcmp.eq.s32.totalorder %v103_v45, 2  ;;  %vm97_vm3 = vcmp.eq.s32.totalorder %v95_v56, 1 }
  0x85   :  { %v57_v27 = vsub.f32 %v53_v24, %v55_v25  ;;  %v46_v28 = vfloor.f32 %v44_v26  ;;  %v107_v5 = vsel %vm105_vm1, -0.17677669, %v195_v2 }
  0x86   :  { %vm113_vm0 = vcmp.eq.s32.totalorder %v111_v44, 2 }
  0x87   :  { %v59_v30 = vmul.f32 %v57_v27, %v57_v27  ;;  %v48_v31 = vmul.f32 1.5703125, %v46_v28  ;;  %v52_v33 = vmul.f32 0.0004837513, %v46_v28  ;;  %v56_v38 = vmul.f32 7.54979e-08, %v46_v28 }
  0x88   :  { %v156_v51 = vcvt.f32.s32 %v46_v28  ;;  %v115_v3 = vsel %vm113_vm0, -0.17677669, %v195_v2 }
  0x89   :  { %v50_v32 = vsub.f32 %v40_v20, %v48_v31  ;;  %v61_v34 = vmul.f32 -0.00019515296, %v59_v30  ;;  %v75_v35 = vmul.f32 2.4433157e-05, %v59_v30  ;;  %v83_v49 = vmul.f32 %v59_v30, %v59_v30 }
  0x8a   :  { %v87_v50 = vmul.f32 0.5, %v59_v30  ;;  %v110_v61 = vadd.s32 1, %v156_v51  ;;  %v104_v13 = vand.u32 2, %v156_v51  ;;  %v96_v17 = vand.u32 1, %v156_v51 }
  0x8b   :  { %v54_v37 = vsub.f32 %v50_v32, %v52_v33  ;;  %v63_v39 = vadd.f32 0.008332161, %v61_v34  ;;  %v77_v40 = vadd.f32 -0.0013887316, %v75_v35 }
  0x8c   :  { %v112_v11 = vand.u32 2, %v110_v61  ;;  %vm106_vm5 = vcmp.eq.s32.totalorder %v104_v13, 2  ;;  %vm98_vm6 = vcmp.eq.s32.totalorder %v96_v17, 1 }
  0x8d   :  { %v58_v41 = vsub.f32 %v54_v37, %v56_v38  ;;  %v65_v42 = vmul.f32 %v63_v39, %v59_v30  ;;  %v79_v43 = vmul.f32 %v77_v40, %v59_v30  ;;  %v108_v24 = vsel %vm106_vm5, -0.17677669, %v195_v2 }
  0x8e   :  { %vm114_vm4 = vcmp.eq.s32.totalorder %v112_v11, 2 }
  0x8f   :  { %v60_v46 = vmul.f32 %v58_v41, %v58_v41  ;;  %v67_v47 = vadd.f32 -0.16666655, %v65_v42  ;;  %v81_v48 = vadd.f32 0.041666646, %v79_v43  ;;  %v116_v23 = vsel %vm114_vm4, -0.17677669, %v195_v2 }
  0x91   :  { %v69_v52 = vmul.f32 %v67_v47, %v59_v30  ;;  %v85_v53 = vmul.f32 %v83_v49, %v81_v48  ;;  %v62_v54 = vmul.f32 -0.00019515296, %v60_v46  ;;  %v76_v55 = vmul.f32 2.4433157e-05, %v60_v46 }
  0x92   :  { %v84_v4 = vmul.f32 %v60_v46, %v60_v46  ;;  %v88_v16 = vmul.f32 0.5, %v60_v46 }
  0x93   :  { %v71_v57 = vmul.f32 %v69_v52, %v57_v27  ;;  %v89_v58 = vsub.f32 %v85_v53, %v87_v50  ;;  %v64_v59 = vadd.f32 0.008332161, %v62_v54  ;;  %v78_v60 = vadd.f32 -0.0013887316, %v76_v55 }
  0x95   :  { %v73_v62 = vadd.f32 %v71_v57, %v57_v27  ;;  %v91_v63 = vadd.f32 1.0, %v89_v58  ;;  %v66_v0 = vmul.f32 %v64_v59, %v60_v46  ;;  %v80_v1 = vmul.f32 %v78_v60, %v60_v46 }
  0x97   :  { %v101_v6 = vsel %vm97_vm3, %v73_v62, %v91_v63  ;;  %v68_v7 = vadd.f32 -0.16666655, %v66_v0  ;;  %v82_v8 = vadd.f32 0.041666646, %v80_v1  ;;  %v99_v9 = vsel %vm97_vm3, %v91_v63, %v73_v62 }
  0x98   :  { %v122_v10 = vmul.f32 %v115_v3, %v101_v6  ;;  %v117_v12 = vmul.f32 %v107_v5, %v99_v9 }
  0x99   :  { %v70_v14 = vmul.f32 %v68_v7, %v60_v46  ;;  %v86_v15 = vmul.f32 %v84_v4, %v82_v8 }
  0x9a   :  { %126 = vrot.lane.b32.xlu2 %v122_v10, %s196_s0  ;;  %120 = vst.msk [vmem:[#allocation2] sm:$0xff] %vm119_vm2, %v117_v12 }
  0x9b   :  { %v72_v18 = vmul.f32 %v70_v14, %v58_v41  ;;  %v90_v19 = vsub.f32 %v86_v15, %v88_v16 }
  0x9d   :  { %v74_v20 = vadd.f32 %v72_v18, %v58_v41  ;;  %v92_v21 = vadd.f32 1.0, %v90_v19 }
  0x9f   :  { %v102_v22 = vsel %vm98_vm6, %v74_v20, %v92_v21  ;;  %v100_v25 = vsel %vm98_vm6, %v92_v21, %v74_v20 }
  0xa0   :  { %v123_v26 = vmul.f32 %v116_v23, %v102_v22  ;;  %v118_v27 = vmul.f32 %v108_v24, %v100_v25 }
  0xa2   :  { %128 = vrot.lane.b32.xlu2 %v123_v26, %s196_s0  ;;  %121 = vst.msk [vmem:[#allocation2 + $0x8] sm:$0xff] %vm119_vm2, %v118_v27 }
  0xf4   :  { %v127_v28 = vpop.permute.xlu2 %126 }
  0xf5   :  { %133 = vst.msk [vmem:[#allocation2] sm:$0xff] %vm132_vm7, %v127_v28 }
  0xfc   :  { %v129_v29 = vpop.permute.xlu2 %128 }
  0xfd   :  { %134 = vst.msk [vmem:[#allocation2 + $0x8] sm:$0xff] %vm132_vm7, %v129_v29 }
  0xfe   :  { %147 = dma.vmem_to_hbm [thread:$0]  %s140_s15, 256, %s142_s18, [#allocation3], %s198_s19, %s198_s19, %s199_s20  }
  0xff   :  { %191 = dma.done.wait [#allocation3], 256  }
 0x100   :  { %192 = vsyncadd [#allocation3], 4294967040 }
 0x101   :  { %152 = vsyncpa [#allocation3], 1 }

</bundles_post_ra>
